<compile_context>
chip_gen: v6e
topology: v6e:2x2x1
jax: 0.10.0
libtpu: 0.0.40
codegen_flags: <defaults>
</compile_context>

<pallas_src>
import jax
import jax.numpy as jnp
from jax.experimental import pallas as pl
from jax.experimental.pallas import tpu as pltpu

_LANE = 128
_SUBLANE = 8


def _round_up(x, m):
    return ((x + m - 1) // m) * m


def _affine_kernel(w_ref, b_ref, x_ref, o_ref):
    # w_ref, b_ref: (1, 1) scalars in SMEM (read once, broadcast by the VPU).
    # x_ref, o_ref: lane-dense tiles in VMEM. 1 vld + 2 VALU + 1 vst per vreg;
    # nothing here comes close to saturating before HBM DMA does.
    o_ref[...] = x_ref[...] * w_ref[0, 0] + b_ref[0, 0]


def affine_slab(x2d, weight, bias, *, block_rows=1024, block_cols=1024,
                vmem_limit_bytes=32 * 1024 * 1024, donate_input=False):
    """Elementwise affine y = x * w + b on a lane-dense (rows, cols) f32 slab.

    This is the zero-relayout I/O contract: callers that can keep their data in
    a (rows, cols) slab with cols % 128 == 0 pay exactly one HBM read + one HBM
    write. `donate_input=True` aliases the input buffer to the output (only use
    when the input is a dead temporary).
    """
    rows, cols = x2d.shape
    assert cols % _LANE == 0, "slab last dim must be a multiple of 128 (lane-dense)"
    assert block_rows % _SUBLANE == 0 and block_cols % _LANE == 0

    x2d = x2d.astype(jnp.float32)
    w2 = jnp.asarray(weight, jnp.float32).reshape(1, 1)
    b2 = jnp.asarray(bias, jnp.float32).reshape(1, 1)

    # Block shape: either a (8,128)-aligned tile, or the full array dim (allowed
    # even when not a multiple of 8/128). Ragged last blocks are handled by
    # Pallas with masked edge writes — no row rounding needed.
    brows = block_rows if rows > block_rows else rows
    bcols = block_cols if cols > block_cols else cols
    grid = (pl.cdiv(rows, brows), pl.cdiv(cols, bcols))

    extra = {"input_output_aliases": {2: 0}} if donate_input else {}

    # TODO(synk): on v7x, verify in xprof that the row-grid axis really shards
    # across both TensorCores; if one TC is idle, switch that axis to
    # pltpu.CORE_PARALLEL (or a core_map split of the row range).
    # If traces show exposed DMA at grid-step boundaries, sweep
    # pipeline_mode=pl.Buffered(3) on the x BlockSpec.
    return pl.pallas_call(
        _affine_kernel,
        out_shape=jax.ShapeDtypeStruct((rows, cols), jnp.float32),
        grid_spec=pltpu.PrefetchScalarGridSpec(
            num_scalar_prefetch=0,
            grid=grid,
            in_specs=[
                pl.BlockSpec(memory_space=pltpu.MemorySpace.SMEM),   # weight (1,1)
                pl.BlockSpec(memory_space=pltpu.MemorySpace.SMEM),   # bias   (1,1)
                pl.BlockSpec((brows, bcols), lambda i, j: (i, j)),   # x tile
            ],
            out_specs=pl.BlockSpec((brows, bcols), lambda i, j: (i, j)),
        ),
        compiler_params=pltpu.CompilerParams(
            dimension_semantics=("parallel", "parallel"),
            vmem_limit_bytes=vmem_limit_bytes,
        ),
        **extra,
    )(w2, b2, x2d)


def sentence_length_bias_net(x, weight, bias, *, block_rows=1024, block_cols=1024,
                             min_pallas_elements=256 * 1024):
    """nn.Linear(1, 1) forward on x of shape (batch, 1) -> (batch, 1).

    Args:
      x:      (batch, 1) float32
      weight: (1, 1)     float32  (PyTorch Linear weight)
      bias:   (1,)       float32  (PyTorch Linear bias)
    """
    batch, feat = x.shape
    assert feat == 1, "SentenceLengthBiasNet expects in_features == 1"

    x = x.astype(jnp.float32)
    w = jnp.asarray(weight, jnp.float32).reshape(())
    b = jnp.asarray(bias, jnp.float32).reshape(())

    n = batch
    if n < min_pallas_elements:
        # Small batches: the pallas_call launch (+ any relayout) dwarfs the
        # work; the fused XLA scalar affine is a single pass and strictly faster.
        return x * w + b

    # Pick a lane-dense column width; pad (if at all) only to a multiple of it.
    cols = block_cols if n >= block_cols else _round_up(n, _LANE)
    rows = pl.cdiv(n, cols)
    n_pad = rows * cols

    if n_pad == n:
        # Pure metadata reshape of a contiguous column — no extra HBM pass.
        # x2 aliases the caller's buffer, so do NOT donate it.
        x2 = x.reshape(rows, cols)
        out2 = affine_slab(x2, w, b, block_rows=block_rows, block_cols=block_cols,
                           donate_input=False)
        return out2.reshape(batch, 1)

    # Only the < cols-element flat tail pad remains; the padded temp is dead
    # after the call, so donate it to the output.
    x2 = jnp.pad(jnp.ravel(x), (0, n_pad - n)).reshape(rows, cols)
    out2 = affine_slab(x2, w, b, block_rows=block_rows, block_cols=block_cols,
                       donate_input=True)
    # TODO(synk): the de-pad slice below is one extra output pass; callers that
    # can accept the slab layout should call affine_slab directly and skip it.
    return out2.reshape(-1)[:n].reshape(batch, 1)


if __name__ == "__main__":
    key = jax.random.PRNGKey(0)
    k_x, k_w, k_b = jax.random.split(key, 3)

    # nn.Linear(1, 1) params: weight (1, 1), bias (1,), uniform(-1, 1)
    # (bound = 1/sqrt(in_features) = 1).
    weight = jax.random.uniform(k_w, (1, 1), jnp.float32, minval=-1.0, maxval=1.0)
    bias = jax.random.uniform(k_b, (1,), jnp.float32, minval=-1.0, maxval=1.0)

    # 1) Lane-dense slab contract (the zero-relayout fast path).
    x_slab = jax.random.normal(k_x, (64, 256), dtype=jnp.float32)
    slab_fn = jax.jit(lambda xs: affine_slab(xs, weight, bias))
    out_slab = jax.block_until_ready(slab_fn(x_slab))
    ref_slab = x_slab * weight[0, 0] + bias[0]
    assert out_slab.shape == x_slab.shape
    assert jnp.allclose(out_slab, ref_slab, atol=1e-6, rtol=1e-6)

    # 2) (batch, 1) module contract, lane-aligned batch -> zero-copy reshape path.
    batch = 512
    x = jax.random.normal(k_x, (batch, 1), dtype=jnp.float32)
    fwd = jax.jit(lambda xb: sentence_length_bias_net(xb, weight, bias,
                                                      min_pallas_elements=0))
    out = jax.block_until_ready(fwd(x))
    ref = x @ weight.T + bias
    assert out.shape == (batch, 1)
    assert jnp.allclose(out, ref, atol=1e-6, rtol=1e-6)

    # 3) Non-aligned batch -> small flat pad + donated temp + masked ragged block.
    x_odd = jax.random.normal(k_b, (300, 1), dtype=jnp.float32)
    out_odd = jax.block_until_ready(fwd(x_odd))
    ref_odd = x_odd @ weight.T + bias
    assert out_odd.shape == (300, 1)
    assert jnp.allclose(out_odd, ref_odd, atol=1e-6, rtol=1e-6)

    # 4) Tiny batch at the default threshold -> fused-XLA fallback path.
    x_small = x[:5]
    out_small = jax.block_until_ready(sentence_length_bias_net(x_small, weight, bias))
    ref_small = x_small @ weight.T + bias
    assert jnp.allclose(out_small, ref_small, atol=1e-6, rtol=1e-6)

    print("KERNEL_OK")
</pallas_src>

<mosaic_0001>
module attributes {stable_mosaic.version = 11 : i64} {
  func.func @_affine_kernel(%arg0: i32, %arg1: i32, %arg2: memref<1x1xf32, #tpu.memory_space<smem>>, %arg3: memref<1x1xf32, #tpu.memory_space<smem>>, %arg4: memref<64x256xf32, #tpu.memory_space<vmem>>, %arg5: memref<64x256xf32, #tpu.memory_space<vmem>>) attributes {dimension_semantics = [#tpu.dimension_semantics<parallel>, #tpu.dimension_semantics<parallel>], iteration_bounds = array<i64: 1, 1>, scalar_prefetch = 0 : i64, scratch_operands = 0 : i64, tpu.core_type = #tpu.core_type<tc>, window_params = [{transform_indices = @transform_0, window_bounds = array<i64: 1, 1>}, {transform_indices = @transform_1, window_bounds = array<i64: 1, 1>}, {transform_indices = @transform_2, window_bounds = array<i64: 64, 256>}, {transform_indices = @transform_3, window_bounds = array<i64: 64, 256>}]} {
    %c0 = arith.constant 0 : index
    %c0_0 = arith.constant 0 : index
    %0 = vector.load %arg4[%c0, %c0_0] : memref<64x256xf32, #tpu.memory_space<vmem>>, vector<64x256xf32>
    %c0_1 = arith.constant 0 : index
    %c0_2 = arith.constant 0 : index
    %1 = memref.load %arg2[%c0_1, %c0_2] : memref<1x1xf32, #tpu.memory_space<smem>>
    %2 = vector.broadcast %1 : f32 to vector<64x256xf32>
    %3 = arith.mulf %0, %2 : vector<64x256xf32>
    %c0_3 = arith.constant 0 : index
    %c0_4 = arith.constant 0 : index
    %4 = memref.load %arg3[%c0_3, %c0_4] : memref<1x1xf32, #tpu.memory_space<smem>>
    %5 = vector.broadcast %4 : f32 to vector<64x256xf32>
    %6 = arith.addf %3, %5 : vector<64x256xf32>
    %c0_5 = arith.constant 0 : index
    %c0_6 = arith.constant 0 : index
    %7 = vector.load %arg5[%c0_5, %c0_6] : memref<64x256xf32, #tpu.memory_space<vmem>>, vector<64x256xf32>
    tpu.vector_store %arg5[%c0_5, %c0_6], %6 {strides = array<i32>} : memref<64x256xf32, #tpu.memory_space<vmem>>, vector<64x256xf32>,
    return
  }
  func.func @transform_0(%arg0: i32, %arg1: i32) -> (i32, i32) {
    %c0_i32 = arith.constant 0 : i32
    %c0_i32_0 = arith.constant 0 : i32
    %c0_i32_1 = arith.constant 0 : i32
    return %c0_i32, %c0_i32_0 : i32, i32
  }
  func.func @transform_1(%arg0: i32, %arg1: i32) -> (i32, i32) {
    %c0_i32 = arith.constant 0 : i32
    %c0_i32_0 = arith.constant 0 : i32
    %c0_i32_1 = arith.constant 0 : i32
    return %c0_i32, %c0_i32_0 : i32, i32
  }
  func.func @transform_2(%arg0: i32, %arg1: i32) -> (i32, i32) {
    %c0_i32 = arith.constant 0 : i32
    return %arg0, %arg1 : i32, i32
  }
  func.func @transform_3(%arg0: i32, %arg1: i32) -> (i32, i32) {
    %c0_i32 = arith.constant 0 : i32
    return %arg0, %arg1 : i32, i32
  }
}

</mosaic_0001>

<bundles_post_ra>
// kernel: _lambda_.1
= control target key start
LH: loop header
LB: loop body
LE: loop exit
PB: predicated region body
PF: predicated region fallthrough
CT: control target
= control target key end

     0   :  { %10 = vsyncpa [#allocation5], 0  ;;  %s224_s0 = inlined_call_operand.<no memory space> [shape: f32[1,1], index: 0, kind: input, shape index: {}]   ;;  %s225_s1 = inlined_call_operand.<no memory space> [shape: f32[1,1], index: 1, kind: input, shape index: {}]   ;;  %s226_s2 = inlined_call_operand.hbm [shape: f32[64,256], index: 2, kind: input, shape index: {}]   ;;  %s227_s3 = inlined_call_operand.hbm [shape: f32[64,256], index: 3, kind: output, shape index: {}]  }
   0x1   :  { %11 = vsyncpa [#allocation6], 0  ;;  %s164_s12 = smov [#allocation4]  }
   0x2   :  { %s21_s13 = sshll.u32 %s164_s12, 4  ;;  %s22_s13 = int_to_ptr.vmem [resolvable:$true] %s21_s13 }
   0x3   :  { %s128_s14 = scalar_lea.vmem %s22_s13, 2048  ;;  %p133_p1 = scmp.lt.s32.totalorder %s22_s13, %s22_s13 }
   0x4   :  { %p129_p0 = scmp.ne.s32.totalorder %s22_s13, %s128_s14  ;;  %p134_p2 = scmp.lt.s32.totalorder %s128_s14, %s128_s14 }
   0x6   :  { %p135_p3 = por %p134_p2, %p133_p1 }
   0x8   :  { %p136_p4 = pnand %p135_p3, %p129_p0 }
   0xa   :  { %139 = shalt.err (!%p136_p4)
}
   0xb   :  { %s165_s15 = smov 256   ;;  %s166_s16 = smov 16  }
   0xc   :  { %27 = dma.hbm_to_vmem [thread:$0]  %s226_s2, 2048, %s22_s13, [#allocation5], %s165_s15, %s165_s15, %s166_s16  }
   0xd   :  { %160 = dma.done.wait [#allocation5], 2048  }
   0xe   :  { %161 = vsyncadd [#allocation5], 4294965248  ;;  %v48_v0 = vstv %s224_s0  ;;  %v31_v1 = vld [vmem:[#allocation4] sm:$0xff]  ;;  %v200_v2 = vstv %s225_s1  ;;  %v32_v3 = vld [vmem:[#allocation4 + $0x8] sm:$0xff]  ;;  %s167_s0 = smov [#allocation7]  }
   0xf   :  { %v33_v4 = vld [vmem:[#allocation4 + $0x10] sm:$0xff]  ;;  %v49_v5 = vmul.f32 %v48_v0, %v31_v1  ;;  %v50_v6 = vmul.f32 %v48_v0, %v32_v3  ;;  %v34_v8 = vld [vmem:[#allocation4 + $0x18] sm:$0xff]  ;;  %v35_v9 = vld [vmem:[#allocation4 + $0x20] sm:$0xff]  ;;  %s104_s1 = sshll.u32 %s167_s0, 4  ;;  %s105_s1 = int_to_ptr.vmem [resolvable:$true] %s104_s1 }
  0x10   :  { %v51_v7 = vmul.f32 %v48_v0, %v33_v4  ;;  %v36_v10 = vld [vmem:[#allocation4 + $0x28] sm:$0xff]  ;;  %v52_v11 = vmul.f32 %v48_v0, %v34_v8  ;;  %v53_v12 = vmul.f32 %v48_v0, %v35_v9  ;;  %v37_v14 = vld [vmem:[#allocation4 + $0x30] sm:$0xff]  ;;  %v38_v15 = vld [vmem:[#allocation4 + $0x38] sm:$0xff]  ;;  %s140_s2 = scalar_lea.vmem %s105_s1, 2048  ;;  %p145_p6 = scmp.lt.s32.totalorder %s105_s1, %s105_s1 }
  0x11   :  { %v54_v13 = vmul.f32 %v48_v0, %v36_v10  ;;  %v39_v16 = vld [vmem:[#allocation4 + $0x40] sm:$0xff]  ;;  %v67_v17 = vadd.f32 %v200_v2, %v49_v5  ;;  %v68_v18 = vadd.f32 %v200_v2, %v50_v6  ;;  %v55_v20 = vmul.f32 %v48_v0, %v37_v14  ;;  %v40_v21 = vld [vmem:[#allocation4 + $0x48] sm:$0xff]  ;;  %v41_v22 = vld [vmem:[#allocation4 + $0x50] sm:$0xff]  ;;  %p141_p5 = scmp.ne.s32.totalorder %s105_s1, %s140_s2  ;;  %p146_p7 = scmp.lt.s32.totalorder %s140_s2, %s140_s2 }
  0x12   :  { %v69_v19 = vadd.f32 %v200_v2, %v51_v7  ;;  %v42_v23 = vld [vmem:[#allocation4 + $0x58] sm:$0xff]  ;;  %v70_v24 = vadd.f32 %v200_v2, %v52_v11  ;;  %v71_v25 = vadd.f32 %v200_v2, %v53_v12  ;;  %v56_v27 = vmul.f32 %v48_v0, %v38_v15  ;;  %v43_v28 = vld [vmem:[#allocation4 + $0x60] sm:$0xff]  ;;  %v44_v29 = vld [vmem:[#allocation4 + $0x68] sm:$0xff] }
  0x13   :  { %v72_v26 = vadd.f32 %v200_v2, %v54_v13  ;;  %v45_v30 = vld [vmem:[#allocation4 + $0x70] sm:$0xff]  ;;  %83 = vst [vmem:[#allocation7] sm:$0xff] %v67_v17  ;;  %84 = vst [vmem:[#allocation7 + $0x8] sm:$0xff] %v68_v18  ;;  %v73_v31 = vadd.f32 %v200_v2, %v55_v20  ;;  %v57_v32 = vmul.f32 %v48_v0, %v39_v16  ;;  %v46_v35 = vld [vmem:[#allocation4 + $0x78] sm:$0xff]  ;;  %p147_p8 = por %p146_p7, %p145_p6 }
  0x14   :  { %85 = vst [vmem:[#allocation7 + $0x10] sm:$0xff] %v69_v19  ;;  %v58_v33 = vmul.f32 %v48_v0, %v40_v21  ;;  %v59_v34 = vmul.f32 %v48_v0, %v41_v22  ;;  %86 = vst [vmem:[#allocation7 + $0x18] sm:$0xff] %v70_v24  ;;  %v74_v36 = vadd.f32 %v200_v2, %v56_v27 }
  0x15   :  { %87 = vst [vmem:[#allocation7 + $0x20] sm:$0xff] %v71_v25  ;;  %88 = vst [vmem:[#allocation7 + $0x28] sm:$0xff] %v72_v26  ;;  %v60_v37 = vmul.f32 %v48_v0, %v42_v23  ;;  %v61_v38 = vmul.f32 %v48_v0, %v43_v28  ;;  %v62_v39 = vmul.f32 %v48_v0, %v44_v29  ;;  %p148_p9 = pnand %p147_p8, %p141_p5 }
  0x16   :  { %89 = vst [vmem:[#allocation7 + $0x30] sm:$0xff] %v73_v31  ;;  %v75_v40 = vadd.f32 %v200_v2, %v57_v32  ;;  %v76_v41 = vadd.f32 %v200_v2, %v58_v33  ;;  %v77_v42 = vadd.f32 %v200_v2, %v59_v34  ;;  %v63_v43 = vmul.f32 %v48_v0, %v45_v30 }
  0x17   :  { %90 = vst [vmem:[#allocation7 + $0x38] sm:$0xff] %v74_v36  ;;  %v78_v44 = vadd.f32 %v200_v2, %v60_v37  ;;  %v79_v45 = vadd.f32 %v200_v2, %v61_v38  ;;  %v80_v46 = vadd.f32 %v200_v2, %v62_v39  ;;  %v64_v47 = vmul.f32 %v48_v0, %v46_v35 }
  0x18   :  { %91 = vst [vmem:[#allocation7 + $0x40] sm:$0xff] %v75_v40  ;;  %92 = vst [vmem:[#allocation7 + $0x48] sm:$0xff] %v76_v41  ;;  %v81_v48 = vadd.f32 %v200_v2, %v63_v43 }
  0x19   :  { %93 = vst [vmem:[#allocation7 + $0x50] sm:$0xff] %v77_v42  ;;  %94 = vst [vmem:[#allocation7 + $0x58] sm:$0xff] %v78_v44  ;;  %v82_v49 = vadd.f32 %v200_v2, %v64_v47 }
  0x1a   :  { %95 = vst [vmem:[#allocation7 + $0x60] sm:$0xff] %v79_v45  ;;  %96 = vst [vmem:[#allocation7 + $0x68] sm:$0xff] %v80_v46 }
  0x1b   :  { %97 = vst [vmem:[#allocation7 + $0x70] sm:$0xff] %v81_v48  ;;  %98 = vst [vmem:[#allocation7 + $0x78] sm:$0xff] %v82_v49 }
  0x1c   :  { %151 = shalt.err (!%p148_p9)
}
  0x1d   :  { %110 = dma.vmem_to_hbm [thread:$0]  %s105_s1, 2048, %s227_s3, [#allocation6], %s165_s15, %s165_s15, %s166_s16  }
  0x1e   :  { %162 = dma.done.wait [#allocation6], 2048  }
  0x1f   :  { %163 = vsyncadd [#allocation6], 4294965248 }
  0x20   :  { %114 = vsyncpa [#allocation5], 1 }
  0x21   :  { %115 = vsyncpa [#allocation6], 1 }

</bundles_post_ra>
